<compile_context>
chip_gen: v5e
topology: v5e:2x2
jax: 0.10.0
libtpu: 0.0.40
codegen_flags: <defaults>
</compile_context>

<pallas_src>
import jax
import jax.numpy as jnp
from jax.experimental import pallas as pl
from jax.experimental.pallas import tpu as pltpu


def _stat_attn_kernel(x_ref, o_ref):
    x = x_ref[...]                                    # (R, HW) float32
    hw = x.shape[-1]
    inv_hw = 1.0 / hw

    # Per-channel (per-row) central moments; reductions over the lane axis.
    mean = jnp.sum(x, axis=-1, keepdims=True) * inv_hw
    d = x - mean
    d2 = d * d
    s2 = jnp.sum(d2, axis=-1, keepdims=True)
    s3 = jnp.sum(d2 * d, axis=-1, keepdims=True)      # d^3 not kept live
    s4 = jnp.sum(d2 * d2, axis=-1, keepdims=True)     # d^4 not kept live

    # Unbiased variance / std (torch.std default).  NaN/inf if H*W == 1,
    # matching PyTorch for that degenerate shape.
    std = jnp.sqrt(s2 * (1.0 / (hw - 1)))
    se = std + 1e-6
    se2 = se * se
    skew = (s3 * inv_hw) / (se2 * se)
    kurt = (s4 * inv_hw) / (se2 * se2)

    # Softmax normalisation: the module multiplies x by the sum of the softmax
    # over its stats, which is 1 up to rounding.  Stabilised exp-sum per row
    # (bounded in [1, 4]) divided exactly by itself.
    m = jnp.maximum(jnp.maximum(mean, std), jnp.maximum(skew, kurt))
    e = (jnp.exp(mean - m) + jnp.exp(std - m)
         + jnp.exp(skew - m) + jnp.exp(kurt - m))
    wsum = e * pl.reciprocal(e, approx=False)         # == 1 within ~1 ulp

    o_ref[...] = (x * wsum).astype(o_ref.dtype)


def _vmem_capacity_bytes():
    try:
        return int(pltpu.get_tpu_info().vmem_capacity_bytes)
    except Exception:
        return 64 << 20        # conservative fallback = v7x per-core VMEM


def statistical_attention(x):
    """x: (N, C, H, W) float32 -> (N, C, H, W) float32."""
    N, C, H, W = x.shape
    HW = H * W
    rows = N * C
    x_flat = x.reshape(rows, HW)

    itemsize = jnp.dtype(x.dtype).itemsize
    row_bytes = HW * itemsize

    # Live set per grid step ~= 2x in + 2x out double buffers plus ~4
    # full-size temporaries (d, d2, transient d3/d4, x*wsum) = ~8x block bytes.
    live_mult = 8
    vmem_cap = _vmem_capacity_bytes()
    vmem_budget = (vmem_cap * 5) // 8          # ~40 MiB v7x, ~80 MiB v5e/v6e
    target_block_bytes = min(8 << 20, max(row_bytes, vmem_budget // live_mult))

    blk_rows = max(1, target_block_bytes // row_bytes)
    if blk_rows >= rows:
        blk_rows = rows                         # single block == full array
    else:
        blk_rows = max(8, (blk_rows // 8) * 8)  # sublane-aligned row blocks
        blk_rows = min(blk_rows, rows)
    # TODO(synk): if a single 8-row slab (8*H*W*4B * live_mult) ever exceeds
    # the v7x VMEM budget (very large spatial maps), add a second streaming
    # grid axis over HW that accumulates raw power sums per channel and
    # applies x * wsum in a second pass.

    grid = (pl.cdiv(rows, blk_rows),)           # partial last block: padded
                                                # rows compute garbage that is
                                                # never written back.

    out_flat = pl.pallas_call(
        _stat_attn_kernel,
        out_shape=jax.ShapeDtypeStruct((rows, HW), x.dtype),
        grid_spec=pltpu.PrefetchScalarGridSpec(
            num_scalar_prefetch=0,
            grid=grid,
            in_specs=[pl.BlockSpec((blk_rows, HW), lambda i: (i, 0))],
            out_specs=pl.BlockSpec((blk_rows, HW), lambda i: (i, 0)),
        ),
        input_output_aliases={0: 0},
        compiler_params=pltpu.CompilerParams(
            dimension_semantics=("parallel",),
            vmem_limit_bytes=int(vmem_budget)),
    )(x_flat)

    return out_flat.reshape(N, C, H, W)


def _reference(x):
    """Pure-JAX reference mirroring the PyTorch module."""
    avg = x.mean(axis=(2, 3), keepdims=True)
    n = x.shape[2] * x.shape[3]
    var = ((x - avg) ** 2).sum(axis=(2, 3), keepdims=True) / (n - 1)
    std = jnp.sqrt(var)
    skew = ((x - avg) ** 3).mean(axis=(2, 3), keepdims=True) / (std + 1e-6) ** 3
    kurt = ((x - avg) ** 4).mean(axis=(2, 3), keepdims=True) / (std + 1e-6) ** 4
    stats = jnp.concatenate([avg, std, skew, kurt], axis=1)
    weights = jax.nn.softmax(stats.mean(axis=(2, 3)), axis=1)[..., None, None]
    return x * weights.sum(axis=1, keepdims=True)


if __name__ == "__main__":
    key = jax.random.PRNGKey(0)
    N, C, H, W = 2, 4, 16, 16
    x = jax.random.normal(key, (N, C, H, W), dtype=jnp.float32)

    # Reference computed first (kernel output may alias the input buffer).
    ref = _reference(x)

    out = statistical_attention(x)
    out = jax.block_until_ready(out)

    assert out.shape == (N, C, H, W)
    assert jnp.allclose(out, ref, atol=1e-5, rtol=1e-5), "mismatch vs reference"

    print("KERNEL_OK")
</pallas_src>

<mosaic_0001>
module attributes {stable_mosaic.version = 11 : i64} {
  func.func @_stat_attn_kernel(%arg0: i32, %arg1: memref<8x256xf32, #tpu.memory_space<vmem>>, %arg2: memref<8x256xf32, #tpu.memory_space<vmem>>) attributes {dimension_semantics = [#tpu.dimension_semantics<parallel>], iteration_bounds = array<i64: 1>, scalar_prefetch = 0 : i64, scratch_operands = 0 : i64, tpu.core_type = #tpu.core_type<tc>, window_params = [{transform_indices = @transform_0, window_bounds = array<i64: 8, 256>}, {transform_indices = @transform_1, window_bounds = array<i64: 8, 256>}]} {
    %c0 = arith.constant 0 : index
    %c0_0 = arith.constant 0 : index
    %0 = vector.load %arg1[%c0, %c0_0] : memref<8x256xf32, #tpu.memory_space<vmem>>, vector<8x256xf32>
    %cst = arith.constant dense<0.000000e+00> : vector<8xf32>
    %1 = vector.multi_reduction <add>, %0, %cst [1] : vector<8x256xf32> to vector<8xf32>
    %2 = vector.shape_cast %1 : vector<8xf32> to vector<8x1xf32>
    %cst_1 = arith.constant 3.906250e-03 : f32
    %3 = vector.broadcast %cst_1 : f32 to vector<8x1xf32>
    %4 = arith.mulf %2, %3 : vector<8x1xf32>
    %5 = vector.broadcast %4 : vector<8x1xf32> to vector<8x256xf32>
    %6 = arith.subf %0, %5 : vector<8x256xf32>
    %7 = arith.mulf %6, %6 : vector<8x256xf32>
    %cst_2 = arith.constant dense<0.000000e+00> : vector<8xf32>
    %8 = vector.multi_reduction <add>, %7, %cst_2 [1] : vector<8x256xf32> to vector<8xf32>
    %9 = vector.shape_cast %8 : vector<8xf32> to vector<8x1xf32>
    %10 = arith.mulf %7, %6 : vector<8x256xf32>
    %cst_3 = arith.constant dense<0.000000e+00> : vector<8xf32>
    %11 = vector.multi_reduction <add>, %10, %cst_3 [1] : vector<8x256xf32> to vector<8xf32>
    %12 = vector.shape_cast %11 : vector<8xf32> to vector<8x1xf32>
    %13 = arith.mulf %7, %7 : vector<8x256xf32>
    %cst_4 = arith.constant dense<0.000000e+00> : vector<8xf32>
    %14 = vector.multi_reduction <add>, %13, %cst_4 [1] : vector<8x256xf32> to vector<8xf32>
    %15 = vector.shape_cast %14 : vector<8xf32> to vector<8x1xf32>
    %cst_5 = arith.constant 0.00392156886 : f32
    %16 = vector.broadcast %cst_5 : f32 to vector<8x1xf32>
    %17 = arith.mulf %9, %16 : vector<8x1xf32>
    %18 = math.sqrt %17 : vector<8x1xf32>
    %cst_6 = arith.constant 9.99999997E-7 : f32
    %19 = vector.broadcast %cst_6 : f32 to vector<8x1xf32>
    %20 = arith.addf %18, %19 : vector<8x1xf32>
    %21 = arith.mulf %20, %20 : vector<8x1xf32>
    %cst_7 = arith.constant 3.906250e-03 : f32
    %22 = vector.broadcast %cst_7 : f32 to vector<8x1xf32>
    %23 = arith.mulf %12, %22 : vector<8x1xf32>
    %24 = arith.mulf %21, %20 : vector<8x1xf32>
    %25 = arith.divf %23, %24 : vector<8x1xf32>
    %cst_8 = arith.constant 3.906250e-03 : f32
    %26 = vector.broadcast %cst_8 : f32 to vector<8x1xf32>
    %27 = arith.mulf %15, %26 : vector<8x1xf32>
    %28 = arith.mulf %21, %21 : vector<8x1xf32>
    %29 = arith.divf %27, %28 : vector<8x1xf32>
    %30 = arith.maximumf %4, %18 : vector<8x1xf32>
    %31 = arith.maximumf %25, %29 : vector<8x1xf32>
    %32 = arith.maximumf %30, %31 : vector<8x1xf32>
    %33 = arith.subf %4, %32 : vector<8x1xf32>
    %34 = math.exp %33 : vector<8x1xf32>
    %35 = arith.subf %18, %32 : vector<8x1xf32>
    %36 = math.exp %35 : vector<8x1xf32>
    %37 = arith.addf %34, %36 : vector<8x1xf32>
    %38 = arith.subf %25, %32 : vector<8x1xf32>
    %39 = math.exp %38 : vector<8x1xf32>
    %40 = arith.addf %37, %39 : vector<8x1xf32>
    %41 = arith.subf %29, %32 : vector<8x1xf32>
    %42 = math.exp %41 : vector<8x1xf32>
    %43 = arith.addf %40, %42 : vector<8x1xf32>
    %44 = tpu.reciprocal %43 : vector<8x1xf32> -> vector<8x1xf32>
    %45 = arith.mulf %43, %44 : vector<8x1xf32>
    %46 = vector.broadcast %45 : vector<8x1xf32> to vector<8x256xf32>
    %47 = arith.mulf %0, %46 : vector<8x256xf32>
    %c0_9 = arith.constant 0 : index
    %c0_10 = arith.constant 0 : index
    %48 = vector.load %arg2[%c0_9, %c0_10] : memref<8x256xf32, #tpu.memory_space<vmem>>, vector<8x256xf32>
    tpu.vector_store %arg2[%c0_9, %c0_10], %47 {strides = array<i32>} : memref<8x256xf32, #tpu.memory_space<vmem>>, vector<8x256xf32>,
    return
  }
  func.func @transform_0(%arg0: i32) -> (i32, i32) {
    %c0_i32 = arith.constant 0 : i32
    %c0_i32_0 = arith.constant 0 : i32
    return %arg0, %c0_i32 : i32, i32
  }
  func.func @transform_1(%arg0: i32) -> (i32, i32) {
    %c0_i32 = arith.constant 0 : i32
    %c0_i32_0 = arith.constant 0 : i32
    return %arg0, %c0_i32 : i32, i32
  }
}

</mosaic_0001>

<bundles_post_ra>
// kernel: tpu_custom_call.1
= control target key start
LH: loop header
LB: loop body
LE: loop exit
PB: predicated region body
PF: predicated region fallthrough
CT: control target
= control target key end

     0   :  { %6 = vsyncpa [#allocation3], 0  ;;  %s253_s0 = inlined_call_operand.hbm [shape: f32[8,256], index: 0, kind: input, shape index: {}, may-alias: {0,1}]   ;;  %s254_s1 = inlined_call_operand.hbm [shape: f32[8,256], index: 1, kind: output, shape index: {}, may-alias: {0,1}]  }
   0x1   :  { %7 = vsyncpa [#allocation4], 0  ;;  %s13_s8 = sshll.u32 %s253_s0, 4  ;;  %s219_s9 = smov [#allocation2]   ;;  %s14_s8 = int_to_ptr.hbm [resolvable:$true] %s13_s8 }
   0x2   :  { %s15_s10 = sshll.u32 %s219_s9, 4  ;;  %s16_s10 = int_to_ptr.vmem [resolvable:$true] %s15_s10 }
   0x3   :  { %18 = dma.hbm_to_vmem [thread:$0]  %s14_s8, 256, %s16_s10, [#allocation3]  }
   0x4   :  { %215 = dma.done.wait [#allocation3], 256  }
   0x5   :  { %216 = vsyncadd [#allocation3], 4294967040  ;;  %v234_v0 = vld [vmem:[#allocation2] sm:$0xff]  ;;  %v236_v1 = vld [vmem:[#allocation2 + $0x8] sm:$0xff]  ;;  %s220_s0 = smov [#allocation5]   ;;  %s139_s14 = sshll.u32 %s254_s1, 4  ;;  %s140_s14 = int_to_ptr.hbm [resolvable:$true] %s139_s14 }
   0x6   :  { %v25_v2 = vadd.f32 %v236_v1, %v234_v0  ;;  %s137_s11 = sshll.u32 %s220_s0, 4  ;;  %s138_s11 = int_to_ptr.vmem [resolvable:$true] %s137_s11 }
   0x8   :  { %26 = vadd.xlane.f32.xlu0 %v25_v2 }
  0x7b   :  { %v27_v3 = vpop.xlane.xlu0 %26 }
  0x7c   :  { %v240_v4 = vmul.f32 0.00390625, %v27_v3 }
  0x7e   :  { %v29_v5 = vsub.f32 %v234_v0, %v240_v4  ;;  %v30_v6 = vsub.f32 %v236_v1, %v240_v4 }
  0x80   :  { %v31_v7 = vmul.f32 %v29_v5, %v29_v5  ;;  %v32_v8 = vmul.f32 %v30_v6, %v30_v6 }
  0x82   :  { %v33_v9 = vadd.f32 %v32_v8, %v31_v7  ;;  %v36_v10 = vmul.f32 %v31_v7, %v29_v5  ;;  %v37_v11 = vmul.f32 %v32_v8, %v30_v6  ;;  %v41_v13 = vmul.f32 %v31_v7, %v31_v7 }
  0x83   :  { %v42_v14 = vmul.f32 %v32_v8, %v32_v8 }
  0x84   :  { %34 = vadd.xlane.f32.xlu0 %v33_v9  ;;  %v38_v12 = vadd.f32 %v37_v11, %v36_v10 }
  0x85   :  { %v43_v15 = vadd.f32 %v42_v14, %v41_v13 }
  0x86   :  { %39 = vadd.xlane.f32.xlu1 %v38_v12 }
  0x8e   :  { %44 = vadd.xlane.f32.xlu1 %v43_v15 }
  0xf7   :  { %v35_v16 = vpop.xlane.xlu0 %34 }
  0xf8   :  { %v46_v17 = vmul.f32 0.003921569, %v35_v16 }
  0xf9   :  { %v40_v32 = vpop.xlane.xlu1 %39 }
  0xfa   :  { %151 = vrsqrt.f32 %v46_v17  ;;  %vm54_vm0 = vcmp.eq.f32.partialorder %v46_v17, inf  ;;  %v57_v25 = vand.u32 2147483648, %v46_v17  ;;  %vm56_vm1 = vcmp.eq.f32.partialorder %v46_v17, 0.0 }
  0xfb   :  { %v61_v49 = vmul.f32 0.00390625, %v40_v32 }
 0x100   :  { %v152_v18 = vpop.eup %151 }
 0x101   :  { %v48_v19 = vmul.f32 %v152_v18, %v46_v17  ;;  %v45_v46 = vpop.xlane.xlu1 %44 }
 0x102   :  { %v78_v53 = vmul.f32 0.00390625, %v45_v46 }
 0x103   :  { %v49_v20 = vmul.f32 %v152_v18, %v48_v19 }
 0x105   :  { %v50_v21 = vmul.f32 0.5, %v49_v20 }
 0x107   :  { %v51_v22 = vsub.f32 1.5, %v50_v21 }
 0x109   :  { %v52_v23 = vmul.f32 %v152_v18, %v51_v22 }
 0x10b   :  { %v53_v24 = vmul.f32 %v52_v23, %v46_v17 }
 0x10d   :  { %v55_v26 = vsel %vm54_vm0, %v46_v17, %v53_v24 }
 0x10e   :  { %v58_v27 = vsel %vm56_vm1, %v57_v25, %v55_v26 }
 0x10f   :  { %v59_v28 = vadd.f32 1e-06, %v58_v27  ;;  %v95_v58 = vmax.f32 %v240_v4, %v58_v27 }
 0x111   :  { %v60_v29 = vmul.f32 %v59_v28, %v59_v28 }
 0x113   :  { %v62_v30 = vmul.f32 %v60_v29, %v59_v28  ;;  %v79_v31 = vmul.f32 %v60_v29, %v60_v29 }
 0x115   :  { %153 = vrcp.f32 %v62_v30  ;;  %v74_v38 = vand.u32 2147483648, %v62_v30  ;;  %v72_v41 = vand.u32 2147483647, %v62_v30  ;;  %v91_v42 = vand.u32 2147483648, %v79_v31 }
 0x116   :  { %155 = vrcp.f32 %v79_v31  ;;  %v89_v44 = vand.u32 2147483647, %v79_v31  ;;  %vm68_vm4 = vweird.f32 %v62_v30  ;;  %vm85_vm6 = vweird.f32 %v79_v31 }
 0x117   :  { %v75_v47 = vor.u32 1.1754944e-38, %v74_v38  ;;  %vm73_vm7 = vcmp.eq.f32.partialorder %v72_v41, 8.507059e+37  ;;  %v92_v51 = vor.u32 1.1754944e-38, %v91_v42 }
 0x118   :  { %vm90_vm9 = vcmp.eq.f32.partialorder %v89_v44, 8.507059e+37 }
 0x11b   :  { %v154_v33 = vpop.eup %153 }
 0x11c   :  { %v156_v34 = vpop.eup %155  ;;  %v64_v35 = vmul.f32 %v154_v33, %v62_v30  ;;  %vm69_vm2 = vweird.f32 %v154_v33 }
 0x11d   :  { %v81_v36 = vmul.f32 %v156_v34, %v79_v31  ;;  %vm86_vm3 = vweird.f32 %v156_v34  ;;  %vm70_vm5 = vmor %vm68_vm4, %vm69_vm2 }
 0x11e   :  { %v65_v37 = vsub.f32 1.0, %v64_v35  ;;  %vm87_vm8 = vmor %vm85_vm6, %vm86_vm3 }
 0x11f   :  { %v82_v39 = vsub.f32 1.0, %v81_v36 }
 0x120   :  { %v66_v40 = vmul.f32 %v154_v33, %v65_v37 }
 0x121   :  { %v83_v43 = vmul.f32 %v156_v34, %v82_v39 }
 0x122   :  { %v67_v45 = vadd.f32 %v154_v33, %v66_v40 }
 0x123   :  { %v84_v48 = vadd.f32 %v156_v34, %v83_v43 }
 0x124   :  { %v71_v50 = vsel %vm70_vm5, %v154_v33, %v67_v45 }
 0x125   :  { %v76_v52 = vsel %vm73_vm7, %v75_v47, %v71_v50  ;;  %v88_v54 = vsel %vm87_vm8, %v156_v34, %v84_v48 }
 0x126   :  { %v77_v55 = vmul.f32 %v76_v52, %v61_v49  ;;  %v93_v56 = vsel %vm90_vm9, %v92_v51, %v88_v54 }
 0x127   :  { %v94_v57 = vmul.f32 %v93_v56, %v78_v53 }
 0x129   :  { %v96_v59 = vmax.f32 %v77_v55, %v94_v57 }
 0x12b   :  { %v97_v60 = vmax.f32 %v95_v58, %v96_v59 }
 0x12d   :  { %v98_v61 = vsub.f32 %v240_v4, %v97_v60  ;;  %v101_v62 = vsub.f32 %v58_v27, %v97_v60  ;;  %v105_v63 = vsub.f32 %v77_v55, %v97_v60  ;;  %v109_v2 = vsub.f32 %v94_v57, %v97_v60 }
 0x12f   :  { %v99_v3 = vmul.f32 1.442695, %v98_v61  ;;  %v102_v5 = vmul.f32 1.442695, %v101_v62  ;;  %v106_v6 = vmul.f32 1.442695, %v105_v63 }
 0x130   :  { %v110_v7 = vmul.f32 1.442695, %v109_v2 }
 0x131   :  { %157 = vpow2.f32 %v99_v3 }
 0x132   :  { %159 = vpow2.f32 %v102_v5 }
 0x133   :  { %161 = vpow2.f32 %v106_v6 }
 0x134   :  { %163 = vpow2.f32 %v110_v7 }
 0x137   :  { %v158_v8 = vpop.eup %157 }
 0x138   :  { %v160_v9 = vpop.eup %159 }
 0x139   :  { %v104_v10 = vadd.f32 %v160_v9, %v158_v8  ;;  %v162_v11 = vpop.eup %161 }
 0x13a   :  { %v164_v13 = vpop.eup %163 }
 0x13b   :  { %v108_v12 = vadd.f32 %v162_v11, %v104_v10 }
 0x13d   :  { %v112_v14 = vadd.f32 %v164_v13, %v108_v12 }
 0x13f   :  { %165 = vrcp.f32 %v112_v14  ;;  %v124_v17 = vand.u32 2147483648, %v112_v14  ;;  %v122_v19 = vand.u32 2147483647, %v112_v14  ;;  %vm118_vm11 = vweird.f32 %v112_v14 }
 0x141   :  { %v125_v21 = vor.u32 1.1754944e-38, %v124_v17  ;;  %vm123_vm13 = vcmp.eq.f32.partialorder %v122_v19, 8.507059e+37 }
 0x145   :  { %v166_v4 = vpop.eup %165 }
 0x146   :  { %v114_v15 = vmul.f32 %v166_v4, %v112_v14  ;;  %vm119_vm10 = vweird.f32 %v166_v4 }
 0x147   :  { %vm120_vm12 = vmor %vm118_vm11, %vm119_vm10 }
 0x148   :  { %v115_v16 = vsub.f32 1.0, %v114_v15 }
 0x14a   :  { %v116_v18 = vmul.f32 %v166_v4, %v115_v16 }
 0x14c   :  { %v117_v20 = vadd.f32 %v166_v4, %v116_v18 }
 0x14e   :  { %v121_v22 = vsel %vm120_vm12, %v166_v4, %v117_v20 }
 0x14f   :  { %v126_v23 = vsel %vm123_vm13, %v125_v21, %v121_v22 }
 0x150   :  { %v127_v24 = vmul.f32 %v126_v23, %v112_v14 }
 0x152   :  { %v128_v25 = vmul.f32 %v127_v24, %v234_v0  ;;  %v129_v26 = vmul.f32 %v127_v24, %v236_v1 }
 0x154   :  { %130 = vst [vmem:[#allocation5] sm:$0xff] %v128_v25 }
 0x155   :  { %131 = vst [vmem:[#allocation5 + $0x8] sm:$0xff] %v129_v26 }
 0x156   :  { %142 = dma.vmem_to_hbm [thread:$0]  %s138_s11, 256, %s140_s14, [#allocation4]  }
 0x157   :  { %217 = dma.done.wait [#allocation4], 256  }
 0x158   :  { %218 = vsyncadd [#allocation4], 4294967040 }
 0x159   :  { %147 = vsyncpa [#allocation3], 1 }
 0x15a   :  { %148 = vsyncpa [#allocation4], 1 }

</bundles_post_ra>
